<compile_context>
chip_gen: v7x
topology: tpu7x:2x2x1
jax: 0.10.0
libtpu: 0.0.40
codegen_flags: <defaults>
</compile_context>

<pallas_src>
import functools
import math

import jax
import jax.numpy as jnp
from jax.experimental import pallas as pl
from jax.experimental.pallas import tpu as pltpu


# ----------------------------- init-time glue -----------------------------
def _softplus(z):
    # numerically stable softplus: exp argument is always <= 0
    return jnp.maximum(z, 0.0) + jnp.log(1.0 + jnp.exp(-jnp.abs(z)))


def _get_cdf(f, scale=1.0):
    """JAX equivalent of get_cdf (softplus -> trapz normalize -> cum-trapz)."""
    u = _softplus(scale * f) / scale
    trap = jnp.sum(u, axis=-1) - 0.5 * (u[..., 0] + u[..., -1])
    u = u / trap[..., None]
    v = 0.5 * (u[..., :-1] + u[..., 1:])
    return jnp.cumsum(v, axis=-1)


def _knn_weights(domain, emb, k, eps=1e-6, alpha=1.0):
    """Brute-force K nearest neighbours of emb points in the domain grid."""
    d = jnp.sqrt(jnp.sum((emb[:, :, None, :] - domain[None, None, :, :]) ** 2, -1))
    neg_d, idx = jax.lax.top_k(-d, k)                   # (E, M, K)
    dist = -neg_d
    w = 1.0 / (eps + dist) ** alpha
    w = w / jnp.sum(w, axis=-1, keepdims=True)
    return w.astype(jnp.float32), idx.astype(jnp.int32)


def _cumtrapz_matrix(M):
    """L (M, M-1) with cumulative_trapezoid(u, dx=1)[j] = sum_i L[i,j]*u[i]."""
    ii = jnp.arange(M)[:, None]
    jj = jnp.arange(M - 1)[None, :]
    L = (jnp.where(ii == 0, 0.5, 0.0)
         + jnp.where((ii >= 1) & (ii <= jj), 1.0, 0.0)
         + jnp.where(ii == jj + 1, 0.5, 0.0))
    return L.astype(jnp.float32)


def _round_up(a, b):
    return -(-a // b) * b


def _vmem_capacity_bytes(default=64 << 20):
    """Generation-aware VMEM capacity (128 MiB v5e/v6e, 64 MiB v7x)."""
    try:
        return int(pltpu.get_tpu_info().vmem_capacity_bytes)
    except Exception:
        return default


def _plan_chunks(E, M, N_pad, pm_itemsize, budget_bytes):
    """Pick (C, EC).

    EC*M is a multiple of 128 (lane-dense projection / Pm tiles), the VMEM
    footprint model includes default double-buffering of every input plus
    scratch/temporaries, and C is forced to be >= 2 and even so the 'parallel'
    grid axis spans both v7x TensorCores (harmless on single-TC v5e/v6e).
    """
    align = 128 // math.gcd(M, 128)              # EC multiple of this -> EC*M % 128 == 0
    per_ec = (2 * N_pad * M * pm_itemsize        # Pm chunk (double-buffered)
              + 2 * M * 4                        # 2*S1 + mask chunks (double-buffered)
              + 12 * M * 4)                      # relayout scratch + f32 temporaries
    fixed = (2 * N_pad * pm_itemsize             # x row (double-buffered)
             + 2 * (M - 1) * M * 4               # cum-trapz matrix
             + (1 << 20))                        # slack for output / compiler scratch
    avail = budget_bytes - fixed
    ec_budget = align
    if avail > per_ec * align:
        ec_budget = max(align, (avail // per_ec) // align * align)
    # TODO(synk): if even EC=align overflows the budget (huge N), tile N too.
    C = max(2, -(-E // ec_budget))
    C += C % 2                                   # even chunk count (v7x: 2 TCs)
    EC = min(_round_up(-(-E // C), align), ec_budget)
    return C, EC


def make_batched_slicer_loss(data, rec_loc, t, embeddings_fn, *,
                             num_neighbors=1, alpha=1.0, eps=1e-6, scale=1.0,
                             proj_dtype=jnp.bfloat16):
    """Builds the constants (the module's __init__) and returns forward(x)."""
    data = jnp.asarray(data, jnp.float32)
    t = jnp.asarray(t, jnp.float32)
    B, R, T = data.shape
    assert rec_loc.shape[1] == R
    N = R * T
    fake_rec_loc = 4.0 * jnp.arange(R, dtype=jnp.float32)
    # torch.cartesian_prod(fake_rec_loc, t): row-major over (rec, t)
    domain = jnp.stack([jnp.repeat(fake_rec_loc, T), jnp.tile(t, R)], -1)    # (N, 2)

    emb = embeddings_fn(rec_loc=fake_rec_loc, t=t)                           # (E, M, 2)
    E, M, _ = emb.shape

    w, idx = _knn_weights(domain, emb, num_neighbors, eps, alpha)            # (E, M, K)
    # Dense projection operator: P[e, m, n] = sum_k w[e,m,k] * [idx[e,m,k] == n]
    P = jnp.sum(jax.nn.one_hot(idx, N, dtype=jnp.float32) * w[..., None], axis=2)

    # TODO(synk): reference proj_function calls .sum(dim=1) on a 1-D tensor (bug);
    # the intended weighted-KNN projection of the data is used for the targets.
    data_flat = data.reshape(B, N)
    proj = jnp.einsum('emn,bn->bem', P, data_flat)                           # (B, E, M)
    cdf_data = _get_cdf(proj, scale=scale)                                   # (B, E, M-1)

    # Fold the data batch out: sum_b (t_b - c)^2 = S2 - <2*S1, c> + B*||c||^2
    S1 = jnp.sum(cdf_data, axis=0)                                           # (E, M-1)
    S2 = jnp.sum(cdf_data * cdf_data)                                        # scalar

    # -------------------------- chunk planning --------------------------
    N_pad = _round_up(N, 8)
    vmem_cap = _vmem_capacity_bytes()
    budget = int(0.5 * vmem_cap)                 # ~32 MiB v7x, ~64 MiB v5e/v6e
    pm_itemsize = jnp.zeros((), proj_dtype).dtype.itemsize
    C, EC = _plan_chunks(E, M, N_pad, pm_itemsize, budget)
    E_pad = C * EC
    ECM = EC * M
    vmem_limit = max(32 << 20, int(0.85 * vmem_cap))

    # ---------------------- constant packing (init) ---------------------
    P_pad = jnp.pad(P, ((0, E_pad - E), (0, 0), (0, N_pad - N)))             # (E_pad, M, N_pad)
    # Pm[c, n, m*EC + e] = P[c*EC + e, m, n]: lane axis holds (m, e) flat, lane-dense.
    Pm = jnp.transpose(P_pad.reshape(C, EC, M, N_pad), (0, 3, 2, 1)).reshape(C, N_pad, ECM)
    Pm = Pm.astype(proj_dtype)                   # bf16 stream: ~2x less HBM traffic

    S1_pad = jnp.pad(2.0 * S1, ((0, E_pad - E), (0, 0)))                     # pre-scaled 2*S1
    S1x2 = jnp.transpose(S1_pad.reshape(C, EC, M - 1), (0, 2, 1))            # (C, M-1, EC)
    bmask = jnp.pad(jnp.full((E, 1), float(B), jnp.float32), ((0, E_pad - E), (0, 0)))
    bmask = jnp.transpose(bmask.reshape(C, EC, 1), (0, 2, 1))                # (C, 1, EC)
    LT = _cumtrapz_matrix(M).T                                               # (M-1, M)

    fwd = functools.partial(
        _batched_slicer_forward, Pm=Pm, LT=LT, S1x2=S1x2, bmask=bmask, S2=S2,
        scale=float(scale), E=E, M=M, N=N, N_pad=N_pad,
        vmem_limit=vmem_limit, proj_dtype=proj_dtype)
    return fwd, (P, cdf_data)


# ------------------------------ Pallas forward -----------------------------
def _batched_slicer_forward(x, *, Pm, LT, S1x2, bmask, S2, scale, E, M, N, N_pad,
                            vmem_limit, proj_dtype):
    C, _, ECM = Pm.shape
    EC = ECM // M
    inv_scale = 1.0 / scale

    def kernel(x_ref, pm_ref, lt_ref, s1_ref, bm_ref, out_ref, s_ref):
        # ---- HBM-bound hot path: one lane-dense bf16 matmul per chunk ----
        uf = jnp.dot(x_ref[...], pm_ref[0],
                     preferred_element_type=jnp.float32)                # (1, M*EC) f32
        z = scale * uf
        # stable softplus (EUP exp/log; never overflows)
        sf = (jnp.maximum(z, 0.0) + jnp.log(1.0 + jnp.exp(-jnp.abs(z)))) * inv_scale
        # ---- relayout flat (m,e) lanes -> (M, EC): M static slice-stores ----
        # (tiny VMEM scratch round-trip; avoids reshape-lowering risk, M is small)
        for m in range(M):
            s_ref[pl.ds(m, 1), :] = sf[:, m * EC:(m + 1) * EC]
        s = s_ref[...]                                                   # (M, EC) f32
        # per-embedding trapezoid normalisation: sublane reduction, no big matrices
        trap = (jnp.sum(s, axis=0, keepdims=True)
                - 0.5 * (s[0:1, :] + s[M - 1:M, :]))                     # (1, EC), > 0
        # NOTE: pl.reciprocal(approx=True) considered (review micro-opt); kept
        # the exact divide to hold the validation tolerance -- kernel is HBM-bound.
        sn = s / trap
        # fused midpoint + cumulative trapezoid: ONE shared (M-1, M) matmul
        cf = jnp.dot(lt_ref[...], sn, preferred_element_type=jnp.float32)  # (M-1, EC)
        # batch-folded squared error: B*cf^2 - 2*S1*cf (padded embeddings: bm = 0)
        val = cf * (bm_ref[0] * cf - s1_ref[0])
        part = jnp.sum(jnp.sum(val, axis=-1, keepdims=True),
                       axis=0, keepdims=True)                            # (1, 1)
        out_ref[0] = part

    x2d = jnp.pad(jnp.asarray(x, jnp.float32).reshape(1, N),
                  ((0, 0), (0, N_pad - N))).astype(proj_dtype)

    partials = pl.pallas_call(
        kernel,
        out_shape=jax.ShapeDtypeStruct((C, 1, 1), jnp.float32),
        grid_spec=pltpu.PrefetchScalarGridSpec(
            num_scalar_prefetch=0,
            grid=(C,),
            in_specs=[
                pl.BlockSpec((1, N_pad), lambda c: (0, 0)),           # x (stays resident)
                pl.BlockSpec((1, N_pad, ECM), lambda c: (c, 0, 0)),   # Pm chunk (big stream)
                pl.BlockSpec((M - 1, M), lambda c: (0, 0)),           # cum-trapz matrix
                pl.BlockSpec((1, M - 1, EC), lambda c: (c, 0, 0)),    # 2*S1 chunk
                pl.BlockSpec((1, 1, EC), lambda c: (c, 0, 0)),        # B * valid-mask
            ],
            out_specs=pl.BlockSpec((1, 1, 1), lambda c: (c, 0, 0)),
            scratch_shapes=[pltpu.VMEM((M, EC), jnp.float32)],        # relayout scratch
        ),
        compiler_params=pltpu.CompilerParams(
            # independent per-chunk partial sums -> true parallel axis (v7x megacore)
            dimension_semantics=("parallel",),
            vmem_limit_bytes=vmem_limit),
    )(x2d, Pm, LT, S1x2, bmask)

    # tiny scalar epilogue: add precomputed sum(tgt^2), divide by E*(M-1)
    return (jnp.sum(partials) + S2) / float(E * (M - 1))


# ------------------------------ pure-JAX reference --------------------------
def _reference_forward(x, P, cdf_data, scale=1.0, proj_dtype=None):
    xp = jnp.asarray(x, jnp.float32)
    Pp = P
    if proj_dtype is not None:   # precision-matched variant (quantize projection inputs)
        xp = xp.astype(proj_dtype).astype(jnp.float32)
        Pp = P.astype(proj_dtype).astype(jnp.float32)
    u = jnp.einsum('emn,n->em', Pp, xp)
    cu = _get_cdf(u, scale=scale)
    return jnp.sum(jnp.mean((cdf_data - cu[None, :, :]) ** 2, axis=(1, 2)))


# ------------------------------------ main ----------------------------------
if __name__ == "__main__":
    key = jax.random.PRNGKey(0)
    kd, kx, ke1, ke2 = jax.random.split(key, 4)

    B, R, T = 2, 4, 16          # data batch, receivers, time samples
    E, M, K = 4, 16, 2          # embeddings, points per embedding, neighbours
    N = R * T

    t = jnp.linspace(0.0, 1.0, T).astype(jnp.float32)
    rec_loc = jnp.zeros((1, R), jnp.float32)            # only shape[1] is used
    data = jax.random.normal(kd, (B, R, T), jnp.float32)

    def embeddings_fn(*, rec_loc, t):
        # deterministic "slices": random points inside the domain bounding box
        xs = jax.random.uniform(ke1, (E, M), minval=float(rec_loc.min()),
                                maxval=float(rec_loc.max()))
        ts = jax.random.uniform(ke2, (E, M), minval=float(t.min()),
                                maxval=float(t.max()))
        return jnp.stack([xs, ts], axis=-1).astype(jnp.float32)

    forward, (P, cdf_data) = make_batched_slicer_loss(
        data, rec_loc, t, embeddings_fn, num_neighbors=K, alpha=1.0, eps=1e-6)

    x = jax.random.normal(kx, (N,), jnp.float32)

    loss = jax.block_until_ready(forward(x))
    ref_matched = jax.block_until_ready(
        _reference_forward(x, P, cdf_data, proj_dtype=jnp.bfloat16))
    ref_f32 = jax.block_until_ready(_reference_forward(x, P, cdf_data))

    assert jnp.isfinite(loss), loss
    # tight check vs. a precision-matched (bf16 projection inputs) reference
    assert jnp.allclose(loss, ref_matched, rtol=1e-3, atol=1e-6), (loss, ref_matched)
    # loose sanity check vs. the full-f32 reference (bf16 stream quantization)
    assert jnp.allclose(loss, ref_f32, rtol=1e-1, atol=5e-3), (loss, ref_f32)
    print("KERNEL_OK")
</pallas_src>

<mosaic_0001>
module attributes {stable_mosaic.version = 11 : i64} {
  func.func @kernel(%arg0: i32, %arg1: memref<1x64xbf16, #tpu.memory_space<vmem>>, %arg2: memref<1x64x128xbf16, #tpu.memory_space<vmem>>, %arg3: memref<15x16xf32, #tpu.memory_space<vmem>>, %arg4: memref<1x15x8xf32, #tpu.memory_space<vmem>>, %arg5: memref<1x1x8xf32, #tpu.memory_space<vmem>>, %arg6: memref<1x1x1xf32, #tpu.memory_space<vmem>>, %arg7: memref<16x8xf32, #tpu.memory_space<vmem>>) attributes {dimension_semantics = [#tpu.dimension_semantics<parallel>], iteration_bounds = array<i64: 2>, scalar_prefetch = 0 : i64, scratch_operands = 1 : i64, tpu.core_type = #tpu.core_type<tc>, window_params = [{pipeline_mode = #tpu.pipeline_mode<synchronous>, transform_indices = @transform_0, window_bounds = array<i64: 1, 64>}, {transform_indices = @transform_1, window_bounds = array<i64: 1, 64, 128>}, {pipeline_mode = #tpu.pipeline_mode<synchronous>, transform_indices = @transform_2, window_bounds = array<i64: 15, 16>}, {transform_indices = @transform_3, window_bounds = array<i64: 1, 15, 8>}, {transform_indices = @transform_4, window_bounds = array<i64: 1, 1, 8>}, {transform_indices = @transform_5, window_bounds = array<i64: 1, 1, 1>}]} {
    %c0 = arith.constant 0 : index
    %c0_0 = arith.constant 0 : index
    %0 = vector.load %arg1[%c0, %c0_0] : memref<1x64xbf16, #tpu.memory_space<vmem>>, vector<1x64xbf16>
    %c0_1 = arith.constant 0 : index
    %c0_2 = arith.constant 0 : index
    %c0_3 = arith.constant 0 : index
    %1 = vector.load %arg2[%c0_1, %c0_2, %c0_3] : memref<1x64x128xbf16, #tpu.memory_space<vmem>>, vector<1x64x128xbf16>
    %2 = vector.shape_cast %1 : vector<1x64x128xbf16> to vector<64x128xbf16>
    %cst = arith.constant dense<0.000000e+00> : vector<1x128xf32>
    %3 = tpu.matmul %0, %2, %cst {dimension_numbers = #tpu.dot_dimension_numbers<[1], [0], [0], [1], [0, 0, 1, 1], [], []>} : vector<1x64xbf16>, vector<64x128xbf16>, vector<1x128xf32> -> vector<1x128xf32>
    %cst_4 = arith.constant 1.000000e+00 : f32
    %4 = vector.broadcast %cst_4 : f32 to vector<1x128xf32>
    %5 = arith.mulf %4, %3 : vector<1x128xf32>
    %cst_5 = arith.constant 0.000000e+00 : f32
    %6 = vector.broadcast %cst_5 : f32 to vector<1x128xf32>
    %7 = arith.maximumf %5, %6 : vector<1x128xf32>
    %8 = math.absf %5 : vector<1x128xf32>
    %cst_6 = arith.constant 0.000000e+00 : f32
    %9 = vector.broadcast %cst_6 : f32 to vector<1x128xf32>
    %10 = arith.subf %9, %8 : vector<1x128xf32>
    %11 = math.exp %10 : vector<1x128xf32>
    %cst_7 = arith.constant 1.000000e+00 : f32
    %12 = vector.broadcast %cst_7 : f32 to vector<1x128xf32>
    %13 = arith.addf %12, %11 : vector<1x128xf32>
    %14 = math.log %13 : vector<1x128xf32>
    %15 = arith.addf %7, %14 : vector<1x128xf32>
    %cst_8 = arith.constant 1.000000e+00 : f32
    %16 = vector.broadcast %cst_8 : f32 to vector<1x128xf32>
    %17 = arith.mulf %15, %16 : vector<1x128xf32>
    %18 = vector.extract_strided_slice %17 {offsets = [0, 0], sizes = [1, 8], strides = [1, 1]} : vector<1x128xf32> to vector<1x8xf32>
    %c0_9 = arith.constant 0 : index
    %c0_10 = arith.constant 0 : index
    %19 = vector.load %arg7[%c0_9, %c0_10] : memref<16x8xf32, #tpu.memory_space<vmem>>, vector<1x8xf32>
    tpu.vector_store %arg7[%c0_9, %c0_10], %18 {strides = array<i32>} : memref<16x8xf32, #tpu.memory_space<vmem>>, vector<1x8xf32>,
    %20 = vector.extract_strided_slice %17 {offsets = [0, 8], sizes = [1, 8], strides = [1, 1]} : vector<1x128xf32> to vector<1x8xf32>
    %c1 = arith.constant 1 : index
    %c0_11 = arith.constant 0 : index
    %21 = vector.load %arg7[%c1, %c0_11] : memref<16x8xf32, #tpu.memory_space<vmem>>, vector<1x8xf32>
    tpu.vector_store %arg7[%c1, %c0_11], %20 {strides = array<i32>} : memref<16x8xf32, #tpu.memory_space<vmem>>, vector<1x8xf32>,
    %22 = vector.extract_strided_slice %17 {offsets = [0, 16], sizes = [1, 8], strides = [1, 1]} : vector<1x128xf32> to vector<1x8xf32>
    %c2 = arith.constant 2 : index
    %c0_12 = arith.constant 0 : index
    %23 = vector.load %arg7[%c2, %c0_12] : memref<16x8xf32, #tpu.memory_space<vmem>>, vector<1x8xf32>
    tpu.vector_store %arg7[%c2, %c0_12], %22 {strides = array<i32>} : memref<16x8xf32, #tpu.memory_space<vmem>>, vector<1x8xf32>,
    %24 = vector.extract_strided_slice %17 {offsets = [0, 24], sizes = [1, 8], strides = [1, 1]} : vector<1x128xf32> to vector<1x8xf32>
    %c3 = arith.constant 3 : index
    %c0_13 = arith.constant 0 : index
    %25 = vector.load %arg7[%c3, %c0_13] : memref<16x8xf32, #tpu.memory_space<vmem>>, vector<1x8xf32>
    tpu.vector_store %arg7[%c3, %c0_13], %24 {strides = array<i32>} : memref<16x8xf32, #tpu.memory_space<vmem>>, vector<1x8xf32>,
    %26 = vector.extract_strided_slice %17 {offsets = [0, 32], sizes = [1, 8], strides = [1, 1]} : vector<1x128xf32> to vector<1x8xf32>
    %c4 = arith.constant 4 : index
    %c0_14 = arith.constant 0 : index
    %27 = vector.load %arg7[%c4, %c0_14] : memref<16x8xf32, #tpu.memory_space<vmem>>, vector<1x8xf32>
    tpu.vector_store %arg7[%c4, %c0_14], %26 {strides = array<i32>} : memref<16x8xf32, #tpu.memory_space<vmem>>, vector<1x8xf32>,
    %28 = vector.extract_strided_slice %17 {offsets = [0, 40], sizes = [1, 8], strides = [1, 1]} : vector<1x128xf32> to vector<1x8xf32>
    %c5 = arith.constant 5 : index
    %c0_15 = arith.constant 0 : index
    %29 = vector.load %arg7[%c5, %c0_15] : memref<16x8xf32, #tpu.memory_space<vmem>>, vector<1x8xf32>
    tpu.vector_store %arg7[%c5, %c0_15], %28 {strides = array<i32>} : memref<16x8xf32, #tpu.memory_space<vmem>>, vector<1x8xf32>,
    %30 = vector.extract_strided_slice %17 {offsets = [0, 48], sizes = [1, 8], strides = [1, 1]} : vector<1x128xf32> to vector<1x8xf32>
    %c6 = arith.constant 6 : index
    %c0_16 = arith.constant 0 : index
    %31 = vector.load %arg7[%c6, %c0_16] : memref<16x8xf32, #tpu.memory_space<vmem>>, vector<1x8xf32>
    tpu.vector_store %arg7[%c6, %c0_16], %30 {strides = array<i32>} : memref<16x8xf32, #tpu.memory_space<vmem>>, vector<1x8xf32>,
    %32 = vector.extract_strided_slice %17 {offsets = [0, 56], sizes = [1, 8], strides = [1, 1]} : vector<1x128xf32> to vector<1x8xf32>
    %c7 = arith.constant 7 : index
    %c0_17 = arith.constant 0 : index
    %33 = vector.load %arg7[%c7, %c0_17] : memref<16x8xf32, #tpu.memory_space<vmem>>, vector<1x8xf32>
    tpu.vector_store %arg7[%c7, %c0_17], %32 {strides = array<i32>} : memref<16x8xf32, #tpu.memory_space<vmem>>, vector<1x8xf32>,
    %34 = vector.extract_strided_slice %17 {offsets = [0, 64], sizes = [1, 8], strides = [1, 1]} : vector<1x128xf32> to vector<1x8xf32>
    %c8 = arith.constant 8 : index
    %c0_18 = arith.constant 0 : index
    %35 = vector.load %arg7[%c8, %c0_18] : memref<16x8xf32, #tpu.memory_space<vmem>>, vector<1x8xf32>
    tpu.vector_store %arg7[%c8, %c0_18], %34 {strides = array<i32>} : memref<16x8xf32, #tpu.memory_space<vmem>>, vector<1x8xf32>,
    %36 = vector.extract_strided_slice %17 {offsets = [0, 72], sizes = [1, 8], strides = [1, 1]} : vector<1x128xf32> to vector<1x8xf32>
    %c9 = arith.constant 9 : index
    %c0_19 = arith.constant 0 : index
    %37 = vector.load %arg7[%c9, %c0_19] : memref<16x8xf32, #tpu.memory_space<vmem>>, vector<1x8xf32>
    tpu.vector_store %arg7[%c9, %c0_19], %36 {strides = array<i32>} : memref<16x8xf32, #tpu.memory_space<vmem>>, vector<1x8xf32>,
    %38 = vector.extract_strided_slice %17 {offsets = [0, 80], sizes = [1, 8], strides = [1, 1]} : vector<1x128xf32> to vector<1x8xf32>
    %c10 = arith.constant 10 : index
    %c0_20 = arith.constant 0 : index
    %39 = vector.load %arg7[%c10, %c0_20] : memref<16x8xf32, #tpu.memory_space<vmem>>, vector<1x8xf32>
    tpu.vector_store %arg7[%c10, %c0_20], %38 {strides = array<i32>} : memref<16x8xf32, #tpu.memory_space<vmem>>, vector<1x8xf32>,
    %40 = vector.extract_strided_slice %17 {offsets = [0, 88], sizes = [1, 8], strides = [1, 1]} : vector<1x128xf32> to vector<1x8xf32>
    %c11 = arith.constant 11 : index
    %c0_21 = arith.constant 0 : index
    %41 = vector.load %arg7[%c11, %c0_21] : memref<16x8xf32, #tpu.memory_space<vmem>>, vector<1x8xf32>
    tpu.vector_store %arg7[%c11, %c0_21], %40 {strides = array<i32>} : memref<16x8xf32, #tpu.memory_space<vmem>>, vector<1x8xf32>,
    %42 = vector.extract_strided_slice %17 {offsets = [0, 96], sizes = [1, 8], strides = [1, 1]} : vector<1x128xf32> to vector<1x8xf32>
    %c12 = arith.constant 12 : index
    %c0_22 = arith.constant 0 : index
    %43 = vector.load %arg7[%c12, %c0_22] : memref<16x8xf32, #tpu.memory_space<vmem>>, vector<1x8xf32>
    tpu.vector_store %arg7[%c12, %c0_22], %42 {strides = array<i32>} : memref<16x8xf32, #tpu.memory_space<vmem>>, vector<1x8xf32>,
    %44 = vector.extract_strided_slice %17 {offsets = [0, 104], sizes = [1, 8], strides = [1, 1]} : vector<1x128xf32> to vector<1x8xf32>
    %c13 = arith.constant 13 : index
    %c0_23 = arith.constant 0 : index
    %45 = vector.load %arg7[%c13, %c0_23] : memref<16x8xf32, #tpu.memory_space<vmem>>, vector<1x8xf32>
    tpu.vector_store %arg7[%c13, %c0_23], %44 {strides = array<i32>} : memref<16x8xf32, #tpu.memory_space<vmem>>, vector<1x8xf32>,
    %46 = vector.extract_strided_slice %17 {offsets = [0, 112], sizes = [1, 8], strides = [1, 1]} : vector<1x128xf32> to vector<1x8xf32>
    %c14 = arith.constant 14 : index
    %c0_24 = arith.constant 0 : index
    %47 = vector.load %arg7[%c14, %c0_24] : memref<16x8xf32, #tpu.memory_space<vmem>>, vector<1x8xf32>
    tpu.vector_store %arg7[%c14, %c0_24], %46 {strides = array<i32>} : memref<16x8xf32, #tpu.memory_space<vmem>>, vector<1x8xf32>,
    %48 = vector.extract_strided_slice %17 {offsets = [0, 120], sizes = [1, 8], strides = [1, 1]} : vector<1x128xf32> to vector<1x8xf32>
    %c15 = arith.constant 15 : index
    %c0_25 = arith.constant 0 : index
    %49 = vector.load %arg7[%c15, %c0_25] : memref<16x8xf32, #tpu.memory_space<vmem>>, vector<1x8xf32>
    tpu.vector_store %arg7[%c15, %c0_25], %48 {strides = array<i32>} : memref<16x8xf32, #tpu.memory_space<vmem>>, vector<1x8xf32>,
    %c0_26 = arith.constant 0 : index
    %c0_27 = arith.constant 0 : index
    %50 = vector.load %arg7[%c0_26, %c0_27] : memref<16x8xf32, #tpu.memory_space<vmem>>, vector<16x8xf32>
    %cst_28 = arith.constant dense<0.000000e+00> : vector<8xf32>
    %51 = vector.multi_reduction <add>, %50, %cst_28 [0] : vector<16x8xf32> to vector<8xf32>
    %52 = vector.shape_cast %51 : vector<8xf32> to vector<1x8xf32>
    %53 = vector.extract_strided_slice %50 {offsets = [0, 0], sizes = [1, 8], strides = [1, 1]} : vector<16x8xf32> to vector<1x8xf32>
    %54 = vector.extract_strided_slice %50 {offsets = [15, 0], sizes = [1, 8], strides = [1, 1]} : vector<16x8xf32> to vector<1x8xf32>
    %55 = arith.addf %53, %54 : vector<1x8xf32>
    %cst_29 = arith.constant 5.000000e-01 : f32
    %56 = vector.broadcast %cst_29 : f32 to vector<1x8xf32>
    %57 = arith.mulf %56, %55 : vector<1x8xf32>
    %58 = arith.subf %52, %57 : vector<1x8xf32>
    %59 = vector.broadcast %58 : vector<1x8xf32> to vector<16x8xf32>
    %60 = arith.divf %50, %59 : vector<16x8xf32>
    %c0_30 = arith.constant 0 : index
    %c0_31 = arith.constant 0 : index
    %61 = vector.load %arg3[%c0_30, %c0_31] : memref<15x16xf32, #tpu.memory_space<vmem>>, vector<15x16xf32>
    %cst_32 = arith.constant dense<0.000000e+00> : vector<15x8xf32>
    %62 = tpu.matmul %61, %60, %cst_32 {dimension_numbers = #tpu.dot_dimension_numbers<[1], [0], [0], [1], [0, 0, 1, 1], [], []>} : vector<15x16xf32>, vector<16x8xf32>, vector<15x8xf32> -> vector<15x8xf32>
    %c0_33 = arith.constant 0 : index
    %c0_34 = arith.constant 0 : index
    %c0_35 = arith.constant 0 : index
    %63 = vector.load %arg5[%c0_33, %c0_34, %c0_35] : memref<1x1x8xf32, #tpu.memory_space<vmem>>, vector<1x1x8xf32>
    %64 = vector.shape_cast %63 : vector<1x1x8xf32> to vector<1x8xf32>
    %65 = vector.broadcast %64 : vector<1x8xf32> to vector<15x8xf32>
    %66 = arith.mulf %65, %62 : vector<15x8xf32>
    %c0_36 = arith.constant 0 : index
    %c0_37 = arith.constant 0 : index
    %c0_38 = arith.constant 0 : index
    %67 = vector.load %arg4[%c0_36, %c0_37, %c0_38] : memref<1x15x8xf32, #tpu.memory_space<vmem>>, vector<1x15x8xf32>
    %68 = vector.shape_cast %67 : vector<1x15x8xf32> to vector<15x8xf32>
    %69 = arith.subf %66, %68 : vector<15x8xf32>
    %70 = arith.mulf %62, %69 : vector<15x8xf32>
    %cst_39 = arith.constant dense<0.000000e+00> : vector<15xf32>
    %71 = vector.multi_reduction <add>, %70, %cst_39 [1] : vector<15x8xf32> to vector<15xf32>
    %72 = vector.shape_cast %71 : vector<15xf32> to vector<15x1xf32>
    %cst_40 = arith.constant dense<0.000000e+00> : vector<1xf32>
    %73 = vector.multi_reduction <add>, %72, %cst_40 [0] : vector<15x1xf32> to vector<1xf32>
    %74 = vector.shape_cast %73 : vector<1xf32> to vector<1x1xf32>
    %c0_41 = arith.constant 0 : index
    %c0_42 = arith.constant 0 : index
    %c0_43 = arith.constant 0 : index
    %75 = vector.load %arg6[%c0_41, %c0_42, %c0_43] : memref<1x1x1xf32, #tpu.memory_space<vmem>>, vector<1x1x1xf32>
    %76 = vector.shape_cast %75 : vector<1x1x1xf32> to vector<1x1xf32>
    %77 = vector.shape_cast %74 : vector<1x1xf32> to vector<1x1x1xf32>
    tpu.vector_store %arg6[%c0_41, %c0_42, %c0_43], %77 {strides = array<i32>} : memref<1x1x1xf32, #tpu.memory_space<vmem>>, vector<1x1x1xf32>,
    return
  }
  func.func @transform_0(%arg0: i32) -> (i32, i32) {
    %c0_i32 = arith.constant 0 : i32
    %c0_i32_0 = arith.constant 0 : i32
    %c0_i32_1 = arith.constant 0 : i32
    return %c0_i32, %c0_i32_0 : i32, i32
  }
  func.func @transform_1(%arg0: i32) -> (i32, i32, i32) {
    %c0_i32 = arith.constant 0 : i32
    %c0_i32_0 = arith.constant 0 : i32
    %c0_i32_1 = arith.constant 0 : i32
    return %arg0, %c0_i32, %c0_i32_0 : i32, i32, i32
  }
  func.func @transform_2(%arg0: i32) -> (i32, i32) {
    %c0_i32 = arith.constant 0 : i32
    %c0_i32_0 = arith.constant 0 : i32
    %c0_i32_1 = arith.constant 0 : i32
    return %c0_i32, %c0_i32_0 : i32, i32
  }
  func.func @transform_3(%arg0: i32) -> (i32, i32, i32) {
    %c0_i32 = arith.constant 0 : i32
    %c0_i32_0 = arith.constant 0 : i32
    %c0_i32_1 = arith.constant 0 : i32
    return %arg0, %c0_i32, %c0_i32_0 : i32, i32, i32
  }
  func.func @transform_4(%arg0: i32) -> (i32, i32, i32) {
    %c0_i32 = arith.constant 0 : i32
    %c0_i32_0 = arith.constant 0 : i32
    %c0_i32_1 = arith.constant 0 : i32
    return %arg0, %c0_i32, %c0_i32_0 : i32, i32, i32
  }
  func.func @transform_5(%arg0: i32) -> (i32, i32, i32) {
    %c0_i32 = arith.constant 0 : i32
    %c0_i32_0 = arith.constant 0 : i32
    %c0_i32_1 = arith.constant 0 : i32
    return %arg0, %c0_i32, %c0_i32_0 : i32, i32, i32
  }
}

</mosaic_0001>

<bundles_post_ra>
// kernel: tpu_custom_call.1
= control target key start
LH: loop header
LB: loop body
LE: loop exit
PB: predicated region body
PF: predicated region fallthrough
CT: control target
= control target key end

     0   :  { %10 = vsyncpa [#allocation4], 0  ;;  %s1034_s0 = inlined_call_operand.vmem [shape: bf16[1,64], index: 0, kind: input, shape index: {}]   ;;  %s1035_s1 = inlined_call_operand.hbm [shape: bf16[2,64,128], index: 1, kind: input, shape index: {}]   ;;  %s1036_s2 = inlined_call_operand.vmem [shape: f32[15,16], index: 2, kind: input, shape index: {}]   ;;  %s1037_s3 = inlined_call_operand.vmem [shape: f32[2,15,8], index: 3, kind: input, shape index: {}]   ;;  %s1038_s4 = inlined_call_operand.vmem [shape: f32[2,1,8], index: 4, kind: input, shape index: {}]   ;;  %s1039_s5 = inlined_call_operand.vmem [shape: f32[2,1,1], index: 5, kind: output, shape index: {}]  }
   0x1   :  { %12 = vsyncpa [#allocation4 + $0x1], 0  ;;  %s885_s18 = smov 0   ;;  %s887_s19 = smov 0  }
   0x2   :  { %s889_s20 = smov 0   ;;  %s891_s21 = smov 0  }
   0x3 LB: > { %s904_s22 = sadd.s32 4294967295, %s833_s21   ;;  %s907_s23 = sadd.s32 1, %s833_s21   ;;  %s833_s21 = sphi %s891_s21, %s1046_s21   ;;  %s829_s20 = sphi %s889_s20, %s1045_s20   ;;  %s825_s19 = sphi %s887_s19, %s1044_s19   ;;  %s821_s18 = sphi %s885_s18, %s1043_s18  }
   0x4   : > { %s43_s24 = ssub.s32 %s833_s21, %s907_s23  ;;  %s46_s25 = sadd.s32 1, %s829_s20 }
   0x5   : > { %p44_p0 = scmp.eq.s32.totalorder %s43_s24, 0  ;;  %p53_p1 = scmp.ne.s32.totalorder %s829_s20, %s825_s19 }
   0x6   : > { %p54_p2 = scmp.eq.s32.totalorder %s833_s21, 0  ;;  %p59_p3 = scmp.ne.s32.totalorder %s825_s19, %s821_s18 }
   0x7   : > { %s917_s26 = scalar_select %p44_p0, %s829_s20, %s46_s25  }
   0x8   : > { %p55_p4 = por %p54_p2, %p53_p1  ;;  %p60_p5 = scmp.eq.s32.totalorder %s904_s22, 0 }
   0x9   : > { %p707_p6 = scmp.lt.s32.totalorder %s833_s21, 2  ;;  %s188_s28 = sand.u32 1, %s829_s20  }
   0xa   : > { %p921_p7 = por %p60_p5, %p59_p3  ;;  %s650_s29 = sshll.u32 %s188_s28, 5 }
   0xb   : > { %s667_s30 = sshll.u32 %s833_s21, 9  ;;  %s192_s9 = scalar_lea.vmem [#allocation3], %s650_s29 }
   0xc   : > { %s930_s8 = scalar_lea.hbm %s1035_s1, %s667_s30  ;;  %s199_s10 = sshll.u32 %s192_s9, 4  ;;  %s932_s10 = int_to_ptr.vmem [resolvable:$true] %s199_s10 }
   0xd   : > { %p934_p8 = pnand %p707_p6, %p55_p4  ;;  %s939_s12 = scalar_lea.sflag [#allocation4], %s188_s28 }
   0xe   : > { %s769_s13 = scalar_lea.hbm %s930_s8, 512  ;;  %s774_s16 = scalar_lea.hbm %s1035_s1, 1024 }
   0xf   : > { %p770_p10 = scmp.ne.s32.totalorder %s930_s8, %s769_s13  ;;  %p771_p11 = pneg %p934_p8 }
  0x10   : > { %p775_p0 = scmp.lt.u32.totalorder %s930_s8, %s1035_s1  ;;  %p776_p1 = scmp.lt.u32.totalorder %s774_s16, %s769_s13 }
  0x11   : > { %p772_p12 = pnand %p771_p11, %p770_p10  ;;  %p778_p3 = scmp.lt.u32.totalorder %s769_s13, %s930_s8 }
  0x12   : > { %p777_p2 = por %p776_p1, %p775_p0 }
  0x13   : > { %p773_p13 = pneg %p772_p12 }
  0x14   : > { %p779_p4 = por %p778_p3, %p777_p2 }
  0x16   : > { %p780_p5 = pnand %p779_p4, %p773_p13 }
  0x18   : > { %783 = shalt.err (!%p780_p5)
}
  0x19   : > { %s784_s24 = scalar_lea.vmem %s932_s10, 512  ;;  %s835_s25 = smov [#allocation3]  }
  0x1a   : > { %p785_p6 = scmp.ne.s32.totalorder %s932_s10, %s784_s24  ;;  %s789_s28 = sshll.u32 %s835_s25, 4  ;;  %s790_s28 = int_to_ptr.vmem [resolvable:$false] %s789_s28 }
  0x1b   : > { %s791_s29 = scalar_lea.vmem %s790_s28, 1024  ;;  %p792_p9 = scmp.lt.s32.totalorder %s932_s10, %s790_s28 }
  0x1c   : > { %p787_p10 = pnand %p785_p6, %p771_p11  ;;  %p793_p0 = scmp.lt.s32.totalorder %s791_s29, %s784_s24 }
  0x1e   : > { %p788_p12 = pneg %p787_p10  ;;  %p794_p1 = por %p793_p0, %p792_p9 }
  0x20   : > { %p795_p2 = pnand %p794_p1, %p788_p12 }
  0x22   : > { %798 = shalt.err (!%p795_p2)
}
  0x23   : > { %s836_s30 = smov 64   ;;  %s837_s6 = smov 4  }
  0x24   : > { %706 = dma.hbm_to_vmem [thread:$0]  (!%p934_p8), %s930_s8, 512, %s932_s10, %s939_s12, %s836_s30, %s836_s30, %s837_s6  }
  0x25   : > { %p221_p11 = scmp.lt.s32.totalorder %s833_s21, 3  ;;  %p1042_p13 = scmp.ge.s32.totalorder %s833_s21, 1 }
  0x27   : > { %p222_p3 = pnand %p1042_p13, %p221_p11 }
  0x28   : > { %s227_s7 = sand.u32 (!%p222_p3), 1, %s825_s19  }
  0x29   : > { %225 = sbr.rel (%p222_p3) target bundleno = 878 (0x36e), region = 40  ;;  %s654_s9 = sshll.u32 (!%p222_p3), %s227_s7, 5 }
  0x2a   : > { %s228_s13 = scalar_lea.sflag (!%p222_p3), [#allocation4], %s227_s7  ;;  %s231_s14 = scalar_lea.vmem (!%p222_p3), [#allocation3], %s654_s9 }
  0x30   : > { %816 = dma.done.wait (%p921_p7), %s228_s13, 512  }
  0x31   : > { %818 = vsyncadd (%p921_p7), %s228_s13, 4294966784  ;;  %v838_v0 = vmov 0.0   ;;  %vm839_vm0 = vmmov 0   ;;  %v759_v1 = vld [vmem:[%s231_s14] sm:$0xff]   ;;  %v760_v2 = vld [vmem:[%s231_s14 + $0x8] sm:$0xff]   ;;  %vm309_vm1 = vcmask 523264   ;;  %v443_v43 = vlaneseq }
  0x32   : > { %678 = vmatprep.subr.bf16.mxu0 %v838_v0  ;;  %686 = vmatprep.mubr.msk.bf16.mxu0 %vm839_vm0, %v838_v0  ;;  %v761_v3 = vld [vmem:[%s231_s14 + $0x10] sm:$0xff]   ;;  %v762_v4 = vld [vmem:[%s231_s14 + $0x18] sm:$0xff]   ;;  %vm362_vm2 = vcmask 57344   ;;  %s840_s27 = smov 104   ;;  %s841_s10 = smov 120   ;;  %vm452_vm3 = vcmask 130048  }
  0x33   : > { %679 = vmatpush3.bf16.msra.mxu0 %v759_v1  ;;  %v276_v5 = vld [vmem:[%s1034_s0] sm:$0x1]  ;;  %s842_s11 = smov 96   ;;  %s843_s12 = smov 112   ;;  %vm427_vm4 = vcmask 64512   ;;  %v444_v47 = vshrl.u32 %v443_v43, 7 }
  0x34   : > { %680 = vmatprep.subr.bf16.mxu0 %v838_v0  ;;  %s844_s15 = smov 80   ;;  %s845_s16 = smov 88   ;;  %v450_v19 = vld [vmem:[%s1036_s2] sm:$0xff]  ;;  %v451_v58 = vld [vmem:[%s1036_s2 + $0x8] sm:$0x7f]  ;;  %vm552_vm5 = vcmask 63488  }
  0x35   : > { %s846_s17 = smov 64   ;;  %s847_s18 = smov 72   ;;  %694 = vmatprep.mubr.msk.f32.mxu1 %vm452_vm3, %v450_v19  ;;  %v445_v51 = vsub.s32 0, %v444_v47  ;;  %vm556_vm6 = vcmask 1046528   ;;  %vm565_vm7 = vcmask 0  }
  0x36   : > { %s848_s24 = smov 48   ;;  %s849_s25 = smov 56  }
  0x37   : > { %681 = vmatpush3.bf16.msra.mxu0 %v760_v2  ;;  %s850_s28 = smov 32   ;;  %s851_s29 = smov 40  }
  0x38   : > { %682 = vmatprep.subr.bf16.mxu0 %v838_v0  ;;  %s852_s30 = smov 16   ;;  %s853_s6 = smov 24  }
  0x39   : > { %s854_s7 = smov 8   ;;  %p264_p7 = scmp.lt.s32.totalorder %s904_s22, 1 }
  0x3b   : > { %683 = vmatpush3.bf16.msra.mxu0 %v761_v3  ;;  %s1048_s22 = smov (!%p264_p7, %s904_s22), 1 }
  0x3c   : > { %684 = vmatprep.subr.bf16.mxu0 %v838_v0  ;;  %s668_s8 = sshll.u32 %s1048_s22, 4 }
  0x3f   : > { %685 = vmatpush3.bf16.msra.mxu0 %v762_v4 }
  0x42   : > { %687 = vmatmul.mubr.msk.bf16.vlgmr.msra.gmra.mrb[0].mxu0 %vm309_vm1, %v276_v5 }
 0x115   : > { %v347_v6 = vpop.f32.mrb[0].mxu0 }
 0x116   : > { %v354_v7 = vand.u32 2147483647, %v347_v6  ;;  %v688_v8 = vpop.f32.mrb[1].mxu0  ;;  %v353_v16 = vmax.f32 %v347_v6, 0.0 }
 0x117   : > { %v350_v9 = vpop.f32.mrb[2].mxu0 }
 0x118   : > { %v355_v10 = vsub.f32 0.0, %v354_v7  ;;  %v689_v11 = vpop.f32.mrb[3].mxu0 }
 0x11a   : > { %v356_v12 = vmul.f32 1.442695, %v355_v10 }
 0x11c   : > { %763 = vpow2.f32 %v356_v12 }
 0x126   : > { %v764_v13 = vpop.eup %763 }
 0x127   : > { %v358_v14 = vadd.f32 1.0, %v764_v13 }
 0x129   : > { %765 = vlog2.f32 %v358_v14 }
 0x133   : > { %v766_v15 = vpop.eup %765 }
 0x134   : > { %v360_v17 = vmul.f32 0.6931472, %v766_v15 }
 0x136   : > { %v361_v18 = vadd.f32 %v360_v17, %v353_v16 }
 0x138   : > { %373 = vrot.lane.b32.xlu1 %v361_v18, %s840_s27  ;;  %365 = vrot.lane.b32.xlu0 %v361_v18, %s841_s10  ;;  %363 = vst.msk [vmem:[#allocation2] sm:$0x1] %vm362_vm2, %v361_v18 }
 0x13c   : > { %377 = vrot.lane.b32.xlu1 %v361_v18, %s842_s11  ;;  %369 = vrot.lane.b32.xlu0 %v361_v18, %s843_s12  ;;  %s271_s11 = scalar_lea.vmem %s1038_s4, %s1048_s22 }
 0x13d   : > { %v664_v59 = vld [vmem:[%s271_s11] ss:$0 sm:$0xff] }
 0x140   : > { %385 = vrot.lane.b32.xlu1 %v361_v18, %s844_s15  ;;  %381 = vrot.lane.b32.xlu0 %v361_v18, %s845_s16  ;;  %s268_s16 = scalar_lea.vmem %s1037_s3, %s668_s8 }
 0x141   : > { %v544_v61 = vld [vmem:[%s268_s16 + $0x8] sm:$0x7f]  ;;  %v543_v0 = vld [vmem:[%s268_s16] sm:$0xff] }
 0x144   : > { %393 = vrot.lane.b32.xlu1 %v361_v18, %s846_s17  ;;  %389 = vrot.lane.b32.xlu0 %v361_v18, %s847_s18 }
 0x148   : > { %401 = vrot.lane.b32.xlu1 %v361_v18, %s848_s24  ;;  %397 = vrot.lane.b32.xlu0 %v361_v18, %s849_s25  ;;  %s274_s24 = scalar_lea.vmem %s1039_s5, %s1048_s22 }
 0x14c   : > { %409 = vrot.lane.b32.xlu1 %v361_v18, %s850_s28  ;;  %405 = vrot.lane.b32.xlu0 %v361_v18, %s851_s29 }
 0x150   : > { %417 = vrot.lane.b32.xlu1 %v361_v18, %s852_s30  ;;  %413 = vrot.lane.b32.xlu0 %v361_v18, %s853_s6 }
 0x154   : > { %421 = vrot.lane.b32.xlu0 %v361_v18, %s854_s7 }
 0x1aa   : > { %v374_v20 = vpop.permute.xlu1 %373  ;;  %v366_v21 = vpop.permute.xlu0 %365 }
 0x1ab   : > { %376 = vst.msk [vmem:[#allocation2 + $0x3] sm:$0x1] %vm362_vm2, %v374_v20  ;;  %368 = vst.msk [vmem:[#allocation2 + $0x1] sm:$0x1] %vm362_vm2, %v366_v21 }
 0x1ae   : > { %v378_v22 = vpop.permute.xlu1 %377  ;;  %v370_v23 = vpop.permute.xlu0 %369 }
 0x1af   : > { %380 = vst.msk [vmem:[#allocation2 + $0x4] sm:$0x1] %vm362_vm2, %v378_v22  ;;  %372 = vst.msk [vmem:[#allocation2 + $0x2] sm:$0x1] %vm362_vm2, %v370_v23 }
 0x1b2   : > { %v386_v24 = vpop.permute.xlu1 %385  ;;  %v382_v25 = vpop.permute.xlu0 %381 }
 0x1b3   : > { %388 = vst.msk [vmem:[#allocation2 + $0x6] sm:$0x1] %vm362_vm2, %v386_v24  ;;  %384 = vst.msk [vmem:[#allocation2 + $0x5] sm:$0x1] %vm362_vm2, %v382_v25 }
 0x1b6   : > { %v394_v26 = vpop.permute.xlu1 %393  ;;  %v390_v27 = vpop.permute.xlu0 %389 }
 0x1b7   : > { %396 = vst.msk [vmem:[#allocation2 + $0x8] sm:$0x1] %vm362_vm2, %v394_v26  ;;  %392 = vst.msk [vmem:[#allocation2 + $0x7] sm:$0x1] %vm362_vm2, %v390_v27 }
 0x1ba   : > { %v402_v28 = vpop.permute.xlu1 %401  ;;  %v398_v29 = vpop.permute.xlu0 %397 }
 0x1bb   : > { %404 = vst.msk [vmem:[#allocation2 + $0xa] sm:$0x1] %vm362_vm2, %v402_v28  ;;  %400 = vst.msk [vmem:[#allocation2 + $0x9] sm:$0x1] %vm362_vm2, %v398_v29 }
 0x1be   : > { %v410_v30 = vpop.permute.xlu1 %409  ;;  %v406_v31 = vpop.permute.xlu0 %405  ;;  %v425_v35 = vld [vmem:[#allocation2] sm:$0xff] }
 0x1bf   : > { %412 = vst.msk [vmem:[#allocation2 + $0xc] sm:$0x1] %vm362_vm2, %v410_v30  ;;  %408 = vst.msk [vmem:[#allocation2 + $0xb] sm:$0x1] %vm362_vm2, %v406_v31  ;;  %v428_v37 = vsel %vm427_vm4, %v425_v35, 0.0 }
 0x1c2   : > { %v418_v32 = vpop.permute.xlu1 %417  ;;  %v414_v33 = vpop.permute.xlu0 %413 }
 0x1c3   : > { %420 = vst.msk [vmem:[#allocation2 + $0xe] sm:$0x1] %vm362_vm2, %v418_v32  ;;  %416 = vst.msk [vmem:[#allocation2 + $0xd] sm:$0x1] %vm362_vm2, %v414_v33 }
 0x1c6   : > { %v422_v34 = vpop.permute.xlu0 %421 }
 0x1c7   : > { %424 = vst.msk [vmem:[#allocation2 + $0xf] sm:$0x1] %vm362_vm2, %v422_v34 }
 0x1ce   : > { %v426_v36 = vld [vmem:[#allocation2 + $0x8] sm:$0xff] }
 0x1cf   : > { %v429_v38 = vsel %vm427_vm4, %v426_v36, 0.0  ;;  %v438_v42 = vrot.slane %v426_v36, 7 }
 0x1d0   : > { %v430_v39 = vadd.f32 %v429_v38, %v428_v37 }
 0x1d1   : > { %v440_v46 = vadd.f32 %v438_v42, %v425_v35 }
 0x1d2   : > { %v431_v40 = vrot.slane %v430_v39, 4 }
 0x1d3   : > { %v441_v50 = vmul.f32 0.5, %v440_v46 }
 0x1d4   : > { %v432_v41 = vadd.f32 %v431_v40, %v430_v39 }
 0x1d6   : > { %v433_v44 = vrot.slane %v432_v41, 2 }
 0x1d8   : > { %v434_v45 = vadd.f32 %v433_v44, %v432_v41 }
 0x1da   : > { %v435_v48 = vrot.slane %v434_v45, 1 }
 0x1dc   : > { %v436_v49 = vadd.f32 %v435_v48, %v434_v45 }
 0x1de   : > { %v442_v52 = vsub.f32 %v436_v49, %v441_v50 }
 0x1e0   : > { %v446_v53 = vrot.slane %v442_v52, %v445_v51 }
 0x1e2   : > { %767 = vrcp.f32 %v446_v53 }
 0x1ec   : > { %v768_v54 = vpop.eup %767 }
 0x1ed   : > { %v448_v55 = vmul.f32 %v768_v54, %v425_v35  ;;  %v449_v56 = vmul.f32 %v768_v54, %v426_v36 }
 0x1ef   : > { %v697_v57 = vpack.c.bf16 %v449_v56, %v448_v55 }
 0x1f1   : > { %698 = vmatprep.subr.bf16.mxu1 %v697_v57 }
 0x1f2   : > { %700 = vmatpush3.bf16.msra.mxu1 %v697_v57 }
 0x1f5   : > { %695 = vmatmul.mubr.msk.f32.vlgmr.msra.gmra.mrb[0].mxu1 %vm452_vm3, %v451_v58 }
 0x2c8   : > { %v696_v60 = vpop.f32.mrb[0].mxu1 }
 0x2c9   : > { %v525_v62 = vpop.f32.mrb[1].mxu1  ;;  %v542_v63 = vmul.f32 %v696_v60, %v664_v59 }
 0x2ca   : > { %v541_v1 = vmul.f32 %v664_v59, %v525_v62 }
 0x2cb   : > { %v546_v2 = vsub.f32 %v542_v63, %v544_v61 }
 0x2cc   : > { %v545_v3 = vsub.f32 %v541_v1, %v543_v0 }
 0x2cd   : > { %v548_v4 = vmul.f32 %v696_v60, %v546_v2 }
 0x2ce   : > { %v547_v5 = vmul.f32 %v545_v3, %v525_v62 }
 0x2cf   : > { %v553_v6 = vsel %vm552_vm5, %v548_v4, 0.0 }
 0x2d0   : > { %554 = vadd.xlane.f32.xlu1 %v553_v6  ;;  %v549_v7 = vsel %vm427_vm4, %v547_v5, 0.0 }
 0x2d1   : > { %550 = vadd.xlane.f32.xlu0 %v549_v7 }
 0x35d   : > { %v555_v8 = vpop.xlane.xlu1 %554 }
 0x35e   : > { %v557_v9 = vsel %vm556_vm6, %v555_v8, 0.0  ;;  %v551_v10 = vpop.xlane.xlu0 %550 }
 0x35f   : > { %v558_v11 = vadd.f32 %v557_v9, %v551_v10 }
 0x361   : > { %v559_v12 = vrot.slane %v558_v11, 4 }
 0x363   : > { %v560_v13 = vadd.f32 %v559_v12, %v558_v11 }
 0x365   : > { %v561_v14 = vrot.slane %v560_v13, 2 }
 0x367   : > { %v562_v15 = vadd.f32 %v561_v14, %v560_v13 }
 0x369   : > { %v563_v16 = vrot.slane %v562_v15, 1 }
 0x36b   : > { %v564_v17 = vadd.f32 %v563_v16, %v562_v15 }
 0x36d   : > { %566 = vst.msk [vmem:[%s274_s24] sm:$0x1] %vm565_vm7, %v564_v17 }
 0x36e PF: > { %p15_p8 = scmp.ge.s32.totalorder %s907_s23, 4   ;;  %s1043_s18 = smov %s825_s19 }
 0x36f   : > { %s1044_s19 = smov %s829_s20  ;;  %s1045_s20 = smov %s917_s26 }
 0x370   : > { %s1046_s21 = smov %s907_s23  ;;  %17 = sbr.rel (!%p15_p8) target bundleno = 3 (0x3), region = 86 }
 0x377   :  { %584 = vsyncpa [#allocation4], 1 }
 0x378   :  { %586 = vsyncpa [#allocation4 + $0x1], 1 }

</bundles_post_ra>
